<compile_context>
chip_gen: v7x
topology: tpu7x:2x2x1
jax: 0.10.0
libtpu: 0.0.40
codegen_flags: <defaults>
</compile_context>

<pallas_src>
import math

import jax
import jax.numpy as jnp
from jax.experimental import pallas as pl
from jax.experimental.pallas import tpu as pltpu


def make_positional_encoding(d_model: int, max_seq_length: int) -> jnp.ndarray:
    """Deterministic sinusoidal table, shape (max_seq_length, d_model), f32."""
    # Same latent assumption as the PyTorch module; make it explicit.
    assert d_model % 2 == 0, "PositionalEncoding requires an even d_model."
    position = jnp.arange(0, max_seq_length, dtype=jnp.float32)[:, None]          # (L, 1)
    div_term = jnp.exp(
        jnp.arange(0, d_model, 2, dtype=jnp.float32) * -(math.log(10000.0) / d_model)
    )                                                                              # (D/2,)
    angles = position * div_term                                                   # (L, D/2)
    pe = jnp.zeros((max_seq_length, d_model), dtype=jnp.float32)
    pe = pe.at[:, 0::2].set(jnp.sin(angles))
    pe = pe.at[:, 1::2].set(jnp.cos(angles))
    return pe


def _add_pe_kernel(x_ref, pe_ref, o_ref):
    # x_ref/o_ref: (tB, tC) tile; pe_ref: (1, tC) shared tile.
    # (tB, tC) + (1, tC) is a cheap sublane broadcast on the VPU; no explicit
    # [None, :, :] reshape needed.
    o_ref[...] = x_ref[...] + pe_ref[...]


def _choose_tiles(B: int, SD: int, itemsize: int, target_bytes: int = 4 << 20):
    """Pick (tB, tC) obeying the (8, 128) block rule with a v7x-safe VMEM budget.

    2 x-bufs + 2 out-bufs at ~target_bytes each plus 2 small pe-bufs stays well
    under the 32 MiB scoped VMEM default on v7x (and is tiny on v5e/v6e).
    """
    # Sublane (row) tile: multiple of 8, or the full batch dim if B < 8 (exempt).
    tB = B if B < 8 else 8
    # Lane (column) tile: multiple of 128 (unmasked vst), or full dim if tiny.
    if SD <= 128:
        tC = SD
    else:
        max_c = max(128, ((target_bytes // (tB * itemsize)) // 128) * 128)
        tC = SD if SD <= max_c else max_c
    return tB, tC


def positional_encoding_forward(x: jnp.ndarray, pe: jnp.ndarray) -> jnp.ndarray:
    """x: (B, S, D), pe: (max_seq_length, D). Returns x + pe[:S] broadcast over batch."""
    B, S, D = x.shape
    SD = S * D

    # Glue (matches self.pe[:, :x.size(1)]); cast so the kernel adds like dtypes.
    pe_s = pe[:S, :].astype(x.dtype)

    # Lane-dense layout: flatten (S, D) into one last axis of length S*D.
    x2d = x.reshape(B, SD)
    pe2d = pe_s.reshape(1, SD)

    tB, tC = _choose_tiles(B, SD, jnp.dtype(x.dtype).itemsize)
    # Column tiles outer, batch tiles inner -> pe block index is constant over
    # the inner axis, so the shared pe tile stays resident across batches.
    grid = (pl.cdiv(SD, tC), pl.cdiv(B, tB))

    out2d = pl.pallas_call(
        _add_pe_kernel,
        out_shape=jax.ShapeDtypeStruct((B, SD), x.dtype),
        grid_spec=pltpu.PrefetchScalarGridSpec(
            num_scalar_prefetch=0,
            grid=grid,
            in_specs=[
                pl.BlockSpec((tB, tC), lambda c, b: (b, c)),   # x tile (changes every step)
                pl.BlockSpec((1, tC), lambda c, b: (0, c)),    # pe tile (resident over batch)
            ],
            out_specs=pl.BlockSpec((tB, tC), lambda c, b: (b, c)),
        ),
        compiler_params=pltpu.CompilerParams(
            dimension_semantics=("parallel", "parallel"),      # lets v7x shard over both TCs
        ),
    )(x2d, pe2d)

    return out2d.reshape(B, S, D)


if __name__ == "__main__":
    # Small shapes consistent with the module's forward: x is (batch, seq, d_model).
    batch, seq, d_model, max_seq_length = 2, 8, 32, 16

    key = jax.random.PRNGKey(0)
    x = jax.random.normal(key, (batch, seq, d_model), dtype=jnp.float32)

    pe = make_positional_encoding(d_model, max_seq_length)

    out = positional_encoding_forward(x, pe)
    out = jax.block_until_ready(out)

    # Reference check against plain JAX semantics of the PyTorch forward.
    ref = x + pe[None, :seq, :]
    assert out.shape == x.shape and out.dtype == x.dtype
    assert jnp.allclose(out, ref, atol=1e-6, rtol=1e-6)

    print("KERNEL_OK")
</pallas_src>

<mosaic_0001>
module attributes {stable_mosaic.version = 11 : i64} {
  func.func @_add_pe_kernel(%arg0: i32, %arg1: i32, %arg2: memref<2x256xf32, #tpu.memory_space<vmem>>, %arg3: memref<1x256xf32, #tpu.memory_space<vmem>>, %arg4: memref<2x256xf32, #tpu.memory_space<vmem>>) attributes {dimension_semantics = [#tpu.dimension_semantics<parallel>, #tpu.dimension_semantics<parallel>], iteration_bounds = array<i64: 1, 1>, scalar_prefetch = 0 : i64, scratch_operands = 0 : i64, tpu.core_type = #tpu.core_type<tc>, window_params = [{transform_indices = @transform_0, window_bounds = array<i64: 2, 256>}, {transform_indices = @transform_1, window_bounds = array<i64: 1, 256>}, {transform_indices = @transform_2, window_bounds = array<i64: 2, 256>}]} {
    %c0 = arith.constant 0 : index
    %c0_0 = arith.constant 0 : index
    %0 = vector.load %arg2[%c0, %c0_0] : memref<2x256xf32, #tpu.memory_space<vmem>>, vector<2x256xf32>
    %c0_1 = arith.constant 0 : index
    %c0_2 = arith.constant 0 : index
    %1 = vector.load %arg3[%c0_1, %c0_2] : memref<1x256xf32, #tpu.memory_space<vmem>>, vector<1x256xf32>
    %2 = vector.broadcast %1 : vector<1x256xf32> to vector<2x256xf32>
    %3 = arith.addf %0, %2 : vector<2x256xf32>
    %c0_3 = arith.constant 0 : index
    %c0_4 = arith.constant 0 : index
    %4 = vector.load %arg4[%c0_3, %c0_4] : memref<2x256xf32, #tpu.memory_space<vmem>>, vector<2x256xf32>
    tpu.vector_store %arg4[%c0_3, %c0_4], %3 {strides = array<i32>} : memref<2x256xf32, #tpu.memory_space<vmem>>, vector<2x256xf32>,
    return
  }
  func.func @transform_0(%arg0: i32, %arg1: i32) -> (i32, i32) {
    %c0_i32 = arith.constant 0 : i32
    return %arg1, %arg0 : i32, i32
  }
  func.func @transform_1(%arg0: i32, %arg1: i32) -> (i32, i32) {
    %c0_i32 = arith.constant 0 : i32
    %c0_i32_0 = arith.constant 0 : i32
    return %c0_i32, %arg0 : i32, i32
  }
  func.func @transform_2(%arg0: i32, %arg1: i32) -> (i32, i32) {
    %c0_i32 = arith.constant 0 : i32
    return %arg1, %arg0 : i32, i32
  }
}

</mosaic_0001>

<bundles_post_ra>
// kernel: tpu_custom_call.1
= control target key start
LH: loop header
LB: loop body
LE: loop exit
PB: predicated region body
PF: predicated region fallthrough
CT: control target
= control target key end

     0   :  { %7 = vsyncpa [#allocation3], 0  ;;  %s157_s0 = inlined_call_operand.hbm [shape: f32[2,256], index: 0, kind: input, shape index: {}]   ;;  %s158_s1 = inlined_call_operand.vmem [shape: f32[1,256], index: 1, kind: input, shape index: {}]   ;;  %s159_s2 = inlined_call_operand.hbm [shape: f32[2,256], index: 2, kind: output, shape index: {}]  }
   0x1   :  { %8 = vsyncpa [#allocation4], 0  ;;  %s112_s9 = smov [#allocation2]   ;;  %s64_s13 = scalar_lea.hbm %s157_s0, 64 }
   0x2   :  { %s15_s10 = sshll.u32 %s112_s9, 4  ;;  %p65_p0 = scmp.ne.s32.totalorder %s157_s0, %s64_s13  ;;  %s16_s10 = int_to_ptr.vmem [resolvable:$true] %s15_s10 }
   0x3   :  { %p68_p1 = scmp.lt.u32.totalorder %s64_s13, %s157_s0 }
   0x5   :  { %p70_p2 = pnand %p68_p1, %p65_p0 }
   0x7   :  { %73 = shalt.err (!%p70_p2)
}
   0x8   :  { %s74_s18 = scalar_lea.vmem %s16_s10, 64  ;;  %p79_p4 = scmp.lt.s32.totalorder %s16_s10, %s16_s10 }
   0x9   :  { %p75_p3 = scmp.ne.s32.totalorder %s16_s10, %s74_s18  ;;  %p80_p5 = scmp.lt.s32.totalorder %s74_s18, %s74_s18 }
   0xb   :  { %p81_p6 = por %p80_p5, %p79_p4 }
   0xd   :  { %p82_p7 = pnand %p81_p6, %p75_p3 }
   0xf   :  { %85 = shalt.err (!%p82_p7)
}
  0x10   :  { %18 = dma.hbm_to_vmem [thread:$0]  %s157_s0, 64, %s16_s10, [#allocation3]  }
  0x11   :  { %108 = dma.done.wait [#allocation3], 64  }
  0x12   :  { %109 = vsyncadd [#allocation3], 4294967232  ;;  %v27_v0 = vlaneseq  ;;  %v113_v1 = vmov 1983009808   ;;  %v25_v7 = vld [vmem:[%s158_s1] sm:$0x3] }
  0x13   :  { %v37_v2 = vunpack.c.l.s4 %v113_v1  ;;  %v24_v12 = vld [vmem:[#allocation2] sm:$0xf]  ;;  %s114_s23 = smov [#allocation5]  }
  0x14   :  { %v28_v3 = vshrl.u32 %v27_v0, 7  ;;  %s52_s0 = sshll.u32 %s114_s23, 4  ;;  %s53_s0 = int_to_ptr.vmem [resolvable:$true] %s52_s0 }
  0x15   :  { %v38_v6 = vunpack.c.0.s8 %v37_v2  ;;  %s86_s24 = scalar_lea.vmem %s53_s0, 64  ;;  %p91_p9 = scmp.lt.s32.totalorder %s53_s0, %s53_s0 }
  0x16   :  { %v29_v4 = vsub.s32 0, %v28_v3  ;;  %v33_v5 = vsub.s32 1, %v28_v3  ;;  %p87_p8 = scmp.ne.s32.totalorder %s53_s0, %s86_s24  ;;  %p92_p10 = scmp.lt.s32.totalorder %s86_s24, %s86_s24 }
  0x17   :  { %v41_v10 = vsub.s32 %v38_v6, %v28_v3 }
  0x18   :  { %v30_v8 = vrot.slane %v25_v7, %v29_v4  ;;  %v34_v9 = vrot.slane %v25_v7, %v33_v5  ;;  %p93_p11 = por %p92_p10, %p91_p9 }
  0x1a   :  { %v35_v11 = vcombine.low %v30_v8, %v34_v9  ;;  %p94_p12 = pnand %p93_p11, %p87_p8 }
  0x1c   :  { %v42_v13 = vrot.slane %v35_v11, %v41_v10 }
  0x1e   :  { %v44_v14 = vadd.f32 %v42_v13, %v24_v12 }
  0x20   :  { %45 = vst [vmem:[#allocation5] sm:$0xf] %v44_v14 }
  0x21   :  { %97 = shalt.err (!%p94_p12)
}
  0x22   :  { %s98_s26 = scalar_lea.hbm %s159_s2, 64 }
  0x23   :  { %p99_p13 = scmp.ne.s32.totalorder %s159_s2, %s98_s26  ;;  %p102_p0 = scmp.lt.u32.totalorder %s98_s26, %s159_s2 }
  0x25   :  { %p104_p1 = pnand %p102_p0, %p99_p13 }
  0x27   :  { %107 = shalt.err (!%p104_p1)
}
  0x28   :  { %55 = dma.vmem_to_hbm [thread:$0]  %s53_s0, 64, %s159_s2, [#allocation4]  }
  0x29   :  { %110 = dma.done.wait [#allocation4], 64  }
  0x2a   :  { %111 = vsyncadd [#allocation4], 4294967232 }
  0x2b   :  { %59 = vsyncpa [#allocation3], 1 }
  0x2c   :  { %60 = vsyncpa [#allocation4], 1 }

</bundles_post_ra>
